<compile_context>
chip_gen: v7x
topology: tpu7x:2x2x1
jax: 0.10.0
libtpu: 0.0.40
codegen_flags: <defaults>
</compile_context>

<pallas_src>
import functools

import jax
import jax.numpy as jnp
from jax.experimental import pallas as pl
from jax.experimental.pallas import tpu as pltpu

LN_EPS = 1e-5          # nn.LayerNorm default
_MAX_TM = 1024         # hard cap on the row tile
_CHUNK = 256           # intra-tile row chunk for MXU/epilogue overlap


# ---------------------------------------------------------------------------
# Generation-aware VMEM sizing.
# ---------------------------------------------------------------------------
_VMEM_CACHE = None


def _vmem_limits():
    """Returns (scoped_vmem_limit_bytes, tile_sizing_budget_bytes)."""
    global _VMEM_CACHE
    if _VMEM_CACHE is None:
        cap = 64 * 1024 * 1024                       # conservative fallback (v7x-sized)
        try:
            cap = int(pltpu.get_tpu_info().vmem_capacity_bytes)
        except Exception:                            # best-effort hardware query
            pass
        limit = max(min((cap * 3) // 4, cap - (8 << 20)), 16 << 20)
        budget = max(limit - (8 << 20), 12 << 20)
        _VMEM_CACHE = (limit, budget)
    return _VMEM_CACHE


def _round_up(x, m):
    return ((x + m - 1) // m) * m


def _snap_rows(tm, n_rows):
    """Snap a VMEM-derived row count to a good tile size."""
    tm = min(int(tm), _MAX_TM)
    if tm >= 128:
        tm = (tm // 128) * 128                      # largest multiple of 128 (MXU M fill)
    else:
        tm = max(8, (tm // 8) * 8)
    tm = min(tm, _round_up(n_rows, 8))              # don't over-tile tiny inputs
    # Guarantee >= 2 grid steps (when rows allow) so the "parallel" row axis can
    # be split across both TensorCores on v7x; negligible cost on 1-TC chips.
    if n_rows >= 16 and pl.cdiv(n_rows, tm) < 2:
        tm = min(tm, _round_up(pl.cdiv(n_rows, 2), 8))
    return max(8, tm)


def _choose_tm_resident(n_rows, e, itemsize, budget):
    """Row tile for the resident-weight path, or None if the weight can't stay
    VMEM-resident under the budget (-> streaming path)."""
    weight_bytes = e * e * itemsize + 3 * e * itemsize   # Buffered(1) constants
    avail = budget - weight_bytes
    if avail <= 0:
        return None
    # x/res/out tiles double-buffered + ~4 f32 epilogue temporaries per row.
    per_row = 3 * 2 * e * itemsize + 4 * e * 4
    tm = avail // per_row
    if tm < 8:
        return None
    return _snap_rows(tm, n_rows)


def _choose_streaming_tiles(n_rows, e, itemsize, budget):
    """(tm, tk) for the K-streaming path (weight streamed in (tk, E) slabs)."""
    tk = e
    for cand in (512, 384, 256, 128):
        if cand < e and e % cand == 0:
            tk = cand
            break
    # TODO(synk): if E is not a multiple of 128 the K axis is not split (tk==E);
    #             add zero-padded K tiles if such an E ever needs streaming.
    fixed = 2 * tk * e * itemsize + 3 * e * itemsize          # w slabs (dbl-buf) + consts
    per_row = 2 * tk * itemsize + 4 * e * itemsize + 4 * e * 4 + 3 * e * 4
    tm = max(8, (budget - fixed) // per_row)
    return _snap_rows(tm, n_rows), tk


# ---------------------------------------------------------------------------
# Kernels.
# ---------------------------------------------------------------------------
def _make_resident_kernel(tm, chunk):
    """Resident-weight path.  Rows are processed in `chunk`-row sub-tiles so the
    MXU matmul of chunk c+1 overlaps the VPU/XLU epilogue of chunk c."""
    nc = tm // chunk

    def kernel(x_ref, res_ref, wt_ref, b_ref, g_ref, be_ref, o_ref):
        bias = b_ref[...].astype(jnp.float32)
        gamma = g_ref[...].astype(jnp.float32)
        beta = be_ref[...].astype(jnp.float32)

        def one_chunk(r0):
            x = x_ref[pl.ds(r0, chunk), :]
            res = res_ref[pl.ds(r0, chunk), :].astype(jnp.float32)
            # wt is pre-transposed to (in, out): contraction (1, 0), native
            # dtype into the MXU, f32 accumulation.
            y = jax.lax.dot_general(
                x, wt_ref[...],
                dimension_numbers=(((1,), (0,)), ((), ())),
                preferred_element_type=jnp.float32)
            y = jnp.maximum(y + bias, 0.0)            # bias + ReLU
            # dropout: identity (inference mode)
            z = y + res                               # residual add
            # Two-pass LayerNorm stats (numerically safer than E[z^2]-mean^2).
            mean = jnp.mean(z, axis=-1, keepdims=True)
            cen = z - mean
            var = jnp.mean(cen * cen, axis=-1, keepdims=True)
            out = cen * jax.lax.rsqrt(var + LN_EPS) * gamma + beta
            o_ref[pl.ds(r0, chunk), :] = out.astype(o_ref.dtype)

        if nc == 1:
            one_chunk(0)
        else:
            def body(c, carry):
                one_chunk(pl.multiple_of(c * chunk, chunk))
                return carry
            jax.lax.fori_loop(0, nc, body, 0, unroll=True)

    return kernel


def _streaming_kernel(x_ref, res_ref, wt_ref, b_ref, g_ref, be_ref, o_ref, acc_ref):
    """Large-E path: K-reduction grid axis, f32 accumulator, fused epilogue."""
    k = pl.program_id(1)

    @pl.when(k == 0)
    def _():
        acc_ref[...] = jnp.zeros_like(acc_ref)

    acc_ref[...] += jax.lax.dot_general(
        x_ref[...], wt_ref[...],
        dimension_numbers=(((1,), (0,)), ((), ())),
        preferred_element_type=jnp.float32)

    @pl.when(k == pl.num_programs(1) - 1)
    def _():
        y = jnp.maximum(acc_ref[...] + b_ref[...].astype(jnp.float32), 0.0)
        # dropout: identity (inference mode)
        z = y + res_ref[...].astype(jnp.float32)
        mean = jnp.mean(z, axis=-1, keepdims=True)
        cen = z - mean
        var = jnp.mean(cen * cen, axis=-1, keepdims=True)
        out = (cen * jax.lax.rsqrt(var + LN_EPS)
               * g_ref[...].astype(jnp.float32) + be_ref[...].astype(jnp.float32))
        o_ref[...] = out.astype(o_ref.dtype)


# ---------------------------------------------------------------------------
# Wrapper.
# ---------------------------------------------------------------------------
@functools.partial(jax.jit, static_argnames=("force_streaming",))
def self_output(hidden_states, input_tensor, w, b, gamma, beta, *,
                force_streaming=False):
    """hidden_states, input_tensor: (..., E). w: (E, E) PyTorch (out, in) layout."""
    orig_shape = hidden_states.shape
    E = orig_shape[-1]
    x = hidden_states.reshape(-1, E)
    res = input_tensor.reshape(-1, E)
    N = x.shape[0]
    itemsize = jnp.dtype(hidden_states.dtype).itemsize
    vmem_limit, vmem_budget = _vmem_limits()

    # One E*E transpose per call so the kernel never re-transposes the weight.
    wt = w.T
    b2 = b.reshape(1, E)
    g2 = gamma.reshape(1, E)
    be2 = beta.reshape(1, E)

    cost = pl.CostEstimate(
        flops=2 * N * E * E,
        transcendentals=N,                          # one rsqrt per row
        bytes_accessed=(3 * N * E + E * E + 3 * E) * itemsize,
    )

    tm = None if force_streaming else _choose_tm_resident(N, E, itemsize, vmem_budget)

    if tm is not None:
        # Fast path: whole weight VMEM-resident, single-buffered.
        chunk = _CHUNK if (tm > _CHUNK and tm % _CHUNK == 0) else tm
        out = pl.pallas_call(
            _make_resident_kernel(tm, chunk),
            out_shape=jax.ShapeDtypeStruct((N, E), hidden_states.dtype),
            grid_spec=pltpu.PrefetchScalarGridSpec(
                num_scalar_prefetch=0,
                grid=(pl.cdiv(N, tm),),
                in_specs=[
                    pl.BlockSpec((tm, E), lambda i: (i, 0)),          # x rows
                    pl.BlockSpec((tm, E), lambda i: (i, 0)),          # residual rows
                    pl.BlockSpec((E, E), lambda i: (0, 0),            # resident weight
                                 pipeline_mode=pl.Buffered(1)),
                    pl.BlockSpec((1, E), lambda i: (0, 0),            # dense bias
                                 pipeline_mode=pl.Buffered(1)),
                    pl.BlockSpec((1, E), lambda i: (0, 0),            # ln weight
                                 pipeline_mode=pl.Buffered(1)),
                    pl.BlockSpec((1, E), lambda i: (0, 0),            # ln bias
                                 pipeline_mode=pl.Buffered(1)),
                ],
                out_specs=pl.BlockSpec((tm, E), lambda i: (i, 0)),
            ),
            compiler_params=pltpu.CompilerParams(
                dimension_semantics=("parallel",),
                vmem_limit_bytes=vmem_limit,
            ),
            cost_estimate=cost,
        )(x, res, wt, b2, g2, be2)
    else:
        # Large-E path: stream (tk, E) weight slabs over a K-reduction axis.
        tm_s, tk = _choose_streaming_tiles(N, E, itemsize, vmem_budget)
        out = pl.pallas_call(
            _streaming_kernel,
            out_shape=jax.ShapeDtypeStruct((N, E), hidden_states.dtype),
            grid_spec=pltpu.PrefetchScalarGridSpec(
                num_scalar_prefetch=0,
                grid=(pl.cdiv(N, tm_s), E // tk),
                in_specs=[
                    pl.BlockSpec((tm_s, tk), lambda i, k: (i, k)),    # x K-slabs
                    pl.BlockSpec((tm_s, E), lambda i, k: (i, 0)),     # residual rows
                    pl.BlockSpec((tk, E), lambda i, k: (k, 0)),       # weight K-slabs
                    pl.BlockSpec((1, E), lambda i, k: (0, 0),
                                 pipeline_mode=pl.Buffered(1)),
                    pl.BlockSpec((1, E), lambda i, k: (0, 0),
                                 pipeline_mode=pl.Buffered(1)),
                    pl.BlockSpec((1, E), lambda i, k: (0, 0),
                                 pipeline_mode=pl.Buffered(1)),
                ],
                out_specs=pl.BlockSpec((tm_s, E), lambda i, k: (i, 0)),
                scratch_shapes=[pltpu.VMEM((tm_s, E), jnp.float32)],
            ),
            compiler_params=pltpu.CompilerParams(
                dimension_semantics=("parallel", "arbitrary"),
                vmem_limit_bytes=vmem_limit,
            ),
            cost_estimate=cost,
        )(x, res, wt, b2, g2, be2)

    return out.reshape(orig_shape)


# ---------------------------------------------------------------------------
# Reference + tests.
# ---------------------------------------------------------------------------
def reference(hidden_states, input_tensor, w, b, gamma, beta):
    y = jnp.maximum(hidden_states @ w.T + b, 0.0)    # dense + ReLU (module has ReLU)
    z = y + input_tensor
    mean = jnp.mean(z, axis=-1, keepdims=True)
    var = jnp.mean((z - mean) ** 2, axis=-1, keepdims=True)
    zn = (z - mean) / jnp.sqrt(var + LN_EPS)
    return zn * gamma + beta


def _run_case(key, batch, seq, embedding_dim, atol, rtol, force_streaming=False):
    k1, k2, k3, k4 = jax.random.split(key, 4)
    hidden_states = jax.random.normal(k1, (batch, seq, embedding_dim), dtype=jnp.float32)
    input_tensor = jax.random.normal(k2, (batch, seq, embedding_dim), dtype=jnp.float32)
    bound = 1.0 / (embedding_dim ** 0.5)
    w = jax.random.uniform(k3, (embedding_dim, embedding_dim),
                           minval=-bound, maxval=bound, dtype=jnp.float32)  # (out, in)
    b = jax.random.uniform(k4, (embedding_dim,),
                           minval=-bound, maxval=bound, dtype=jnp.float32)
    gamma = jnp.ones((embedding_dim,), dtype=jnp.float32)
    beta = jnp.zeros((embedding_dim,), dtype=jnp.float32)

    out = jax.block_until_ready(
        self_output(hidden_states, input_tensor, w, b, gamma, beta,
                    force_streaming=force_streaming))
    ref = reference(hidden_states, input_tensor, w, b, gamma, beta)
    assert out.shape == hidden_states.shape
    assert jnp.allclose(out, ref, atol=atol, rtol=rtol), "mismatch vs reference"


if __name__ == "__main__":
    key = jax.random.PRNGKey(0)
    k_a, k_b, k_c, k_d = jax.random.split(key, 4)
    # Module-sized toy case (spec scale).
    _run_case(k_a, batch=2, seq=8, embedding_dim=32, atol=1e-5, rtol=1e-5)
    # Lane-full E and a row count NOT a multiple of the tile: exercises the
    # pad-free cdiv grid with a masked partial last block.
    _run_case(k_b, batch=3, seq=67, embedding_dim=128, atol=1e-4, rtol=1e-4)
    # Large row tile: exercises the chunked (MXU/epilogue-overlapped) path plus
    # a partial last block.
    _run_case(k_c, batch=4, seq=300, embedding_dim=128, atol=1e-4, rtol=1e-4)
    # Force the large-E K-streaming path (accumulator + pl.when finalize).
    _run_case(k_d, batch=2, seq=48, embedding_dim=256, atol=1e-4, rtol=1e-4,
              force_streaming=True)
    print("KERNEL_OK")
</pallas_src>

<mosaic_0001>
module attributes {stable_mosaic.version = 11 : i64} {
  func.func @kernel(%arg0: i32, %arg1: memref<8x32xf32, #tpu.memory_space<vmem>>, %arg2: memref<8x32xf32, #tpu.memory_space<vmem>>, %arg3: memref<32x32xf32, #tpu.memory_space<vmem>>, %arg4: memref<1x32xf32, #tpu.memory_space<vmem>>, %arg5: memref<1x32xf32, #tpu.memory_space<vmem>>, %arg6: memref<1x32xf32, #tpu.memory_space<vmem>>, %arg7: memref<8x32xf32, #tpu.memory_space<vmem>>) attributes {dimension_semantics = [#tpu.dimension_semantics<parallel>], iteration_bounds = array<i64: 2>, scalar_prefetch = 0 : i64, scratch_operands = 0 : i64, tpu.core_type = #tpu.core_type<tc>, window_params = [{transform_indices = @transform_0, window_bounds = array<i64: 8, 32>}, {transform_indices = @transform_1, window_bounds = array<i64: 8, 32>}, {pipeline_mode = #tpu.pipeline_mode<synchronous>, transform_indices = @transform_2, window_bounds = array<i64: 32, 32>}, {pipeline_mode = #tpu.pipeline_mode<synchronous>, transform_indices = @transform_3, window_bounds = array<i64: 1, 32>}, {pipeline_mode = #tpu.pipeline_mode<synchronous>, transform_indices = @transform_4, window_bounds = array<i64: 1, 32>}, {pipeline_mode = #tpu.pipeline_mode<synchronous>, transform_indices = @transform_5, window_bounds = array<i64: 1, 32>}, {transform_indices = @transform_6, window_bounds = array<i64: 8, 32>}]} {
    %c0 = arith.constant 0 : index
    %c0_0 = arith.constant 0 : index
    %0 = vector.load %arg4[%c0, %c0_0] : memref<1x32xf32, #tpu.memory_space<vmem>>, vector<1x32xf32>
    %c0_1 = arith.constant 0 : index
    %c0_2 = arith.constant 0 : index
    %1 = vector.load %arg5[%c0_1, %c0_2] : memref<1x32xf32, #tpu.memory_space<vmem>>, vector<1x32xf32>
    %c0_3 = arith.constant 0 : index
    %c0_4 = arith.constant 0 : index
    %2 = vector.load %arg6[%c0_3, %c0_4] : memref<1x32xf32, #tpu.memory_space<vmem>>, vector<1x32xf32>
    %c0_5 = arith.constant 0 : index
    %c0_6 = arith.constant 0 : index
    %3 = vector.load %arg1[%c0_5, %c0_6] : memref<8x32xf32, #tpu.memory_space<vmem>>, vector<8x32xf32>
    %c0_7 = arith.constant 0 : index
    %c0_8 = arith.constant 0 : index
    %4 = vector.load %arg2[%c0_7, %c0_8] : memref<8x32xf32, #tpu.memory_space<vmem>>, vector<8x32xf32>
    %c0_9 = arith.constant 0 : index
    %c0_10 = arith.constant 0 : index
    %5 = vector.load %arg3[%c0_9, %c0_10] : memref<32x32xf32, #tpu.memory_space<vmem>>, vector<32x32xf32>
    %cst = arith.constant dense<0.000000e+00> : vector<8x32xf32>
    %6 = tpu.matmul %3, %5, %cst {dimension_numbers = #tpu.dot_dimension_numbers<[1], [0], [0], [1], [0, 0, 1, 1], [], []>} : vector<8x32xf32>, vector<32x32xf32>, vector<8x32xf32> -> vector<8x32xf32>
    %7 = vector.broadcast %0 : vector<1x32xf32> to vector<8x32xf32>
    %8 = arith.addf %6, %7 : vector<8x32xf32>
    %cst_11 = arith.constant 0.000000e+00 : f32
    %9 = vector.broadcast %cst_11 : f32 to vector<8x32xf32>
    %10 = arith.maximumf %8, %9 : vector<8x32xf32>
    %11 = arith.addf %10, %4 : vector<8x32xf32>
    %cst_12 = arith.constant dense<0.000000e+00> : vector<8xf32>
    %12 = vector.multi_reduction <add>, %11, %cst_12 [1] : vector<8x32xf32> to vector<8xf32>
    %13 = vector.shape_cast %12 : vector<8xf32> to vector<8x1xf32>
    %cst_13 = arith.constant 3.200000e+01 : f32
    %14 = vector.broadcast %cst_13 : f32 to vector<8x1xf32>
    %15 = arith.divf %13, %14 : vector<8x1xf32>
    %16 = vector.broadcast %15 : vector<8x1xf32> to vector<8x32xf32>
    %17 = arith.subf %11, %16 : vector<8x32xf32>
    %18 = arith.mulf %17, %17 : vector<8x32xf32>
    %cst_14 = arith.constant dense<0.000000e+00> : vector<8xf32>
    %19 = vector.multi_reduction <add>, %18, %cst_14 [1] : vector<8x32xf32> to vector<8xf32>
    %20 = vector.shape_cast %19 : vector<8xf32> to vector<8x1xf32>
    %cst_15 = arith.constant 3.200000e+01 : f32
    %21 = vector.broadcast %cst_15 : f32 to vector<8x1xf32>
    %22 = arith.divf %20, %21 : vector<8x1xf32>
    %cst_16 = arith.constant 9.99999974E-6 : f32
    %23 = vector.broadcast %cst_16 : f32 to vector<8x1xf32>
    %24 = arith.addf %22, %23 : vector<8x1xf32>
    %25 = math.rsqrt %24 : vector<8x1xf32>
    %26 = vector.broadcast %25 : vector<8x1xf32> to vector<8x32xf32>
    %27 = arith.mulf %17, %26 : vector<8x32xf32>
    %28 = vector.broadcast %1 : vector<1x32xf32> to vector<8x32xf32>
    %29 = arith.mulf %27, %28 : vector<8x32xf32>
    %30 = vector.broadcast %2 : vector<1x32xf32> to vector<8x32xf32>
    %31 = arith.addf %29, %30 : vector<8x32xf32>
    %c0_17 = arith.constant 0 : index
    %c0_18 = arith.constant 0 : index
    %32 = vector.load %arg7[%c0_17, %c0_18] : memref<8x32xf32, #tpu.memory_space<vmem>>, vector<8x32xf32>
    tpu.vector_store %arg7[%c0_17, %c0_18], %31 {strides = array<i32>} : memref<8x32xf32, #tpu.memory_space<vmem>>, vector<8x32xf32>,
    return
  }
  func.func @transform_0(%arg0: i32) -> (i32, i32) {
    %c0_i32 = arith.constant 0 : i32
    %c0_i32_0 = arith.constant 0 : i32
    return %arg0, %c0_i32 : i32, i32
  }
  func.func @transform_1(%arg0: i32) -> (i32, i32) {
    %c0_i32 = arith.constant 0 : i32
    %c0_i32_0 = arith.constant 0 : i32
    return %arg0, %c0_i32 : i32, i32
  }
  func.func @transform_2(%arg0: i32) -> (i32, i32) {
    %c0_i32 = arith.constant 0 : i32
    %c0_i32_0 = arith.constant 0 : i32
    %c0_i32_1 = arith.constant 0 : i32
    return %c0_i32, %c0_i32_0 : i32, i32
  }
  func.func @transform_3(%arg0: i32) -> (i32, i32) {
    %c0_i32 = arith.constant 0 : i32
    %c0_i32_0 = arith.constant 0 : i32
    %c0_i32_1 = arith.constant 0 : i32
    return %c0_i32, %c0_i32_0 : i32, i32
  }
  func.func @transform_4(%arg0: i32) -> (i32, i32) {
    %c0_i32 = arith.constant 0 : i32
    %c0_i32_0 = arith.constant 0 : i32
    %c0_i32_1 = arith.constant 0 : i32
    return %c0_i32, %c0_i32_0 : i32, i32
  }
  func.func @transform_5(%arg0: i32) -> (i32, i32) {
    %c0_i32 = arith.constant 0 : i32
    %c0_i32_0 = arith.constant 0 : i32
    %c0_i32_1 = arith.constant 0 : i32
    return %c0_i32, %c0_i32_0 : i32, i32
  }
  func.func @transform_6(%arg0: i32) -> (i32, i32) {
    %c0_i32 = arith.constant 0 : i32
    %c0_i32_0 = arith.constant 0 : i32
    return %arg0, %c0_i32 : i32, i32
  }
}

</mosaic_0001>

<bundles_post_ra>
// kernel: self_output.1
= control target key start
LH: loop header
LB: loop body
LE: loop exit
PB: predicated region body
PF: predicated region fallthrough
CT: control target
= control target key end

     0   :  { %11 = vsyncpa [#allocation3], 0  ;;  %s781_s0 = inlined_call_operand.vmem [shape: f32[16,32], index: 0, kind: input, shape index: {}]   ;;  %s782_s1 = inlined_call_operand.vmem [shape: f32[16,32], index: 1, kind: input, shape index: {}]   ;;  %s783_s2 = inlined_call_operand.vmem [shape: f32[32,32], index: 2, kind: input, shape index: {}]   ;;  %s784_s3 = inlined_call_operand.vmem [shape: f32[1,32], index: 3, kind: input, shape index: {}]   ;;  %s785_s4 = inlined_call_operand.vmem [shape: f32[1,32], index: 4, kind: input, shape index: {}]   ;;  %s786_s5 = inlined_call_operand.vmem [shape: f32[1,32], index: 5, kind: input, shape index: {}]   ;;  %s787_s6 = inlined_call_operand.hbm [shape: f32[16,32], index: 6, kind: output, shape index: {}]  }
   0x1   :  { %13 = vsyncpa [#allocation3 + $0x1], 0  ;;  %s653_s21 = smov 0   ;;  %s655_s22 = smov 0  }
   0x2   :  { %s657_s23 = smov 0   ;;  %s659_s24 = smov 0  }
   0x3 LB: > { %s674_s25 = sadd.s32 4294967295, %s612_s24   ;;  %s469_s26 = sadd.s32 4294967294, %s612_s24   ;;  %s612_s24 = sphi %s659_s24, %s793_s24   ;;  %s608_s23 = sphi %s657_s23, %s792_s23   ;;  %s604_s22 = sphi %s655_s22, %s791_s22   ;;  %s600_s21 = sphi %s653_s21, %s790_s21  }
   0x4   : > { %s678_s27 = sadd.s32 1, %s612_s24   ;;  %s162_s28 = sadd.s32 1, %s608_s23 }
   0x5   : > { %s159_s29 = ssub.s32 %s612_s24, %s678_s27  ;;  %p172_p0 = scmp.ne.s32.totalorder %s608_s23, %s604_s22 }
   0x6   : > { %p160_p1 = scmp.eq.s32.totalorder %s159_s29, 0  ;;  %p173_p2 = scmp.eq.s32.totalorder %s674_s25, 1 }
   0x7   : > { %p178_p3 = scmp.ne.s32.totalorder %s604_s22, %s600_s21  ;;  %p179_p4 = scmp.eq.s32.totalorder %s469_s26, 1 }
   0x8   : > { %s689_s30 = scalar_select %p160_p1, %s608_s23, %s162_s28  }
   0x9   : > { %p691_p5 = por %p173_p2, %p172_p0  ;;  %p695_p6 = por %p179_p4, %p178_p3 }
   0xa   : > { %p472_p7 = scmp.ge.s32.totalorder %s612_s24, 1  ;;  %p223_p8 = scmp.lt.s32.totalorder %s612_s24, 3 }
   0xc   : > { %p224_p9 = pnand %p472_p7, %p223_p8 }
   0xd   : > { %v269_v0 = vld [vmem:[%s783_s2] sm:$0xff] (!%p224_p9)  ;;  %v270_v1 = vld [vmem:[%s783_s2 + $0x8] sm:$0xff] (!%p224_p9)  ;;  %v271_v2 = vld [vmem:[%s783_s2 + $0x10] sm:$0xff] (!%p224_p9)  ;;  %v614_v3 = vmov (!%p224_p9), 0.0|0.0   ;;  %vm615_vm0 = vmmov (!%p224_p9), 0   ;;  %v616_v6 = vmov (!%p224_p9), 0.0  }
   0xe   : > { %227 = sbr.rel (%p224_p9) target bundleno = 571 (0x23b), region = 44  ;;  %500 = vmatprep.subr.bf16.mxu0 (!%p224_p9), %v614_v3  ;;  %v501_v4 = vpack.c.bf16 (!%p224_p9), %v270_v1, %v269_v0  ;;  %v272_v5 = vld [vmem:[%s783_s2 + $0x18] sm:$0xff] (!%p224_p9)  ;;  %497 = vmatprep.mubr.msk.f32.mxu0 (!%p224_p9), %vm615_vm0, %v616_v6  ;;  %p256_p10 = scmp.lt.s32.totalorder (!%p224_p9), %s674_s25, 1  ;;  %vm279_vm1 = vcmask (!%p224_p9), 261120   ;;  %v476_v9 = vld [vmem:[%s784_s3] ss:$0 sm:$0xff] (!%p224_p9) }
   0xf   : > { %v504_v7 = vpack.c.bf16 (!%p224_p9), %v272_v5, %v271_v2  ;;  %s253_s12 = sand.u32 (!%p224_p9), 1, %s604_s22   ;;  %v478_v26 = vld [vmem:[%s785_s4] ss:$0 sm:$0xff] (!%p224_p9) }
  0x10   : > { %502 = vmatpush3.bf16.msra.mxu0 (!%p224_p9), %v501_v4  ;;  %s473_s13 = sshll.u32 (!%p224_p9), %s253_s12, 3  ;;  %v479_v28 = vld [vmem:[%s786_s5] ss:$0 sm:$0xff] (!%p224_p9)  ;;  %s385_s9 = scalar_lea.sflag (!%p224_p9), [#allocation3], %s253_s12 }
  0x11   : > { %503 = vmatprep.subr.bf16.mxu0 (!%p224_p9), %v614_v3  ;;  %s255_s19 = scalar_lea.vmem (!%p224_p9), [#allocation2], %s473_s13 }
  0x12   : > { %s398_s20 = sshll.u32 (!%p224_p9), %s255_s19, 4  ;;  %s740_s20 = int_to_ptr.vmem [resolvable:$true] %s398_s20 }
  0x13   : > { %s550_s10 = scalar_lea.vmem (!%p224_p9), %s740_s20, 128 }
  0x14   : > { %505 = vmatpush3.bf16.msra.mxu0 (!%p224_p9), %v504_v7  ;;  %p551_p11 = scmp.ne.s32.totalorder (!%p224_p9), %s740_s20, %s550_s10 }
  0x15   : > { %s257_s17 = scalar_select %p256_p10, %s674_s25, 1 }
  0x16   : > { %p552_p12 = pnand %p551_p11, %p691_p5 }
  0x17   : > { %s474_s18 = sshll.u32 %s257_s17, 3 }
  0x18   : > { %s259_s26 = scalar_lea.vmem %s781_s0, %s474_s18  ;;  %s263_s11 = scalar_lea.vmem %s782_s1, %s474_s18 }
  0x19   : > { %v267_v8 = vld [vmem:[%s259_s26] sm:$0xff]  ;;  %s481_s18 = sshll.u32 %s674_s25, 7  ;;  %p553_p13 = pneg %p552_p12 }
  0x1a   : > { %498 = vmatmul.mubr.msk.f32.vlgmr.msra.gmra.mrb[0].mxu0 %vm279_vm1, %v267_v8  ;;  %v268_v13 = vld [vmem:[%s263_s11] sm:$0xff]  ;;  %s738_s29 = scalar_lea.hbm %s787_s6, %s481_s18  ;;  %s617_s25 = smov [#allocation2]  }
  0x1b   : > { %s554_s11 = sshll.u32 %s617_s25, 4  ;;  %s555_s11 = int_to_ptr.vmem [resolvable:$false] %s554_s11 }
  0x1c   : > { %s556_s13 = scalar_lea.vmem %s555_s11, 256  ;;  %p557_p0 = scmp.lt.s32.totalorder %s740_s20, %s555_s11 }
  0x1d   : > { %p558_p1 = scmp.lt.s32.totalorder %s556_s13, %s550_s10 }
  0x1f   : > { %p559_p2 = por %p558_p1, %p557_p0 }
  0x21   : > { %p560_p3 = pnand %p559_p2, %p553_p13 }
  0xed   : > { %v349_v10 = vpop.f32.mrb[0].mxu0 }
  0xee   : > { %v350_v11 = vadd.f32 %v476_v9, %v349_v10  ;;  %v499_v12 = vpop.f32.mrb[1].mxu0 }
  0xf0   : > { %v353_v14 = vmax.f32 %v350_v11, 0.0 }
  0xf2   : > { %v354_v15 = vadd.f32 %v353_v14, %v268_v13 }
  0xf4   : > { %v355_v16 = vsel %vm279_vm1, %v354_v15, 0.0 }
  0xf5   : > { %356 = vadd.xlane.f32.xlu0 %v355_v16 }
 0x182   : > { %v357_v17 = vpop.xlane.xlu0 %356 }
 0x183   : > { %v359_v18 = vmul.f32 0.03125, %v357_v17 }
 0x185   : > { %v360_v19 = vsub.f32 %v354_v15, %v359_v18 }
 0x187   : > { %v361_v20 = vmul.f32 %v360_v19, %v360_v19 }
 0x189   : > { %v362_v21 = vsel %vm279_vm1, %v361_v20, 0.0 }
 0x18a   : > { %363 = vadd.xlane.f32.xlu0 %v362_v21 }
 0x217   : > { %v364_v22 = vpop.xlane.xlu0 %363 }
 0x218   : > { %v365_v23 = vmul.f32 0.03125, %v364_v22 }
 0x21a   : > { %v366_v24 = vadd.f32 1e-05, %v365_v23 }
 0x21c   : > { %548 = vrsqrt.f32 %v366_v24 }
 0x226   : > { %v549_v25 = vpop.eup %548 }
 0x227   : > { %v368_v27 = vmul.f32 %v549_v25, %v360_v19 }
 0x229   : > { %v375_v29 = vmul.f32 %v478_v26, %v368_v27 }
 0x22b   : > { %v382_v30 = vadd.f32 %v479_v28, %v375_v29 }
 0x22d   : > { %383 = vst.msk [vmem:[%s255_s19] sm:$0xff] %vm279_vm1, %v382_v30 }
 0x22e   : > { %563 = shalt.err (!%p560_p3)
}
 0x22f   : > { %s564_s12 = scalar_lea.hbm %s738_s29, 128  ;;  %s568_s16 = scalar_lea.hbm %s787_s6, 256 }
 0x230   : > { %p565_p4 = scmp.ne.s32.totalorder %s738_s29, %s564_s12  ;;  %p569_p9 = scmp.lt.u32.totalorder %s738_s29, %s787_s6 }
 0x231   : > { %p570_p10 = scmp.lt.u32.totalorder %s568_s16, %s564_s12  ;;  %p572_p12 = scmp.lt.u32.totalorder %s564_s12, %s738_s29 }
 0x232   : > { %p566_p7 = pnand %p565_p4, %p691_p5 }
 0x233   : > { %p571_p11 = por %p570_p10, %p569_p9 }
 0x234   : > { %p567_p8 = pneg %p566_p7 }
 0x235   : > { %p573_p13 = por %p572_p12, %p571_p11 }
 0x237   : > { %p574_p0 = pnand %p573_p13, %p567_p8 }
 0x239   : > { %577 = shalt.err (!%p574_p0)
}
 0x23a   : > { %506 = dma.vmem_to_hbm [thread:$0]  (%p691_p5), %s740_s20, 128, %s738_s29, %s385_s9  }
 0x23b PF: > { %p512_p1 = scmp.ge.s32.totalorder %s612_s24, 2  ;;  %s410_s19 = sand.u32 1, %s600_s21  }
 0x23c   : > { %s411_s26 = scalar_lea.sflag [#allocation3], %s410_s19 }
 0x23d   : > { %p509_p2 = pnand %p512_p1, %p695_p6 }
 0x23f   : > { %595 = dma.done.wait (!%p509_p2), %s411_s26, 128  }
 0x240   : > { %597 = vsyncadd (!%p509_p2), %s411_s26, 4294967168  ;;  %p16_p3 = scmp.ge.s32.totalorder %s678_s27, 4   ;;  %s790_s21 = smov %s604_s22 }
 0x241   : > { %s791_s22 = smov %s608_s23  ;;  %s792_s23 = smov %s689_s30 }
 0x242   : > { %s793_s24 = smov %s678_s27  ;;  %18 = sbr.rel (!%p16_p3) target bundleno = 3 (0x3), region = 82 }
 0x249   :  { %416 = vsyncpa [#allocation3], 1 }
 0x24a   :  { %418 = vsyncpa [#allocation3 + $0x1], 1 }

</bundles_post_ra>
